<compile_context>
chip_gen: v7x
topology: tpu7x:2x2x1
jax: 0.10.0
libtpu: 0.0.40
codegen_flags: <defaults>
</compile_context>

<pallas_src>
import math

import jax
import jax.numpy as jnp
from jax.experimental import pallas as pl
from jax.experimental.pallas import tpu as pltpu


def _round_up(a, b):
    return ((a + b - 1) // b) * b


# ----------------------------------------------------------------------------
# Kernel 1: score = tanh(w0 * (x @ transform) + w1 * diag(M)),  node axis on lanes
# ----------------------------------------------------------------------------
def _score_kernel(xt_ref, dm_ref, t_ref, w_ref, score_ref):
    xt = xt_ref[...]                                        # [C, TN]  (x^T tile)
    t = t_ref[...]                                          # [C, 1]
    # (x @ transform)^T for this node tile: broadcast-mul + cheap sublane reduce.
    xtransform = jnp.sum(xt * t, axis=0, keepdims=True)     # [1, TN]
    w0 = w_ref[0]                                           # SMEM scalars
    w1 = w_ref[1]
    # dm_ref is the precomputed diag(M) tile -> only 4 B/node of M traffic.
    score_ref[...] = jnp.tanh(w0 * xtransform + w1 * dm_ref[...])  # nonlinearity=tanh


def score_pallas(x_t, diag_m, transform, pan_pool_weight):
    C, N = x_t.shape
    # With M's (TN,TN) block removed, per-step VMEM is ~C*TN*4 double-buffered, so a
    # large lane-multiple tile is safe on v5e/v6e/v7x alike.
    TN = N if N <= 2048 else 2048
    grid = (pl.cdiv(N, TN),)
    return pl.pallas_call(
        _score_kernel,
        grid=grid,
        in_specs=[
            pl.BlockSpec((C, TN), lambda i: (0, i)),            # x^T node tile
            pl.BlockSpec((1, TN), lambda i: (0, i)),            # diag(M) tile (lane-dense)
            pl.BlockSpec((C, 1), lambda i: (0, 0)),             # transform (resident)
            pl.BlockSpec(memory_space=pltpu.MemorySpace.SMEM),  # pan_pool_weight
        ],
        out_specs=pl.BlockSpec((1, TN), lambda i: (0, i)),      # lane-dense score
        out_shape=jax.ShapeDtypeStruct((1, N), jnp.float32),
        compiler_params=pltpu.CompilerParams(
            dimension_semantics=("parallel",)),
    )(x_t, diag_m.reshape(1, N), transform.reshape(C, 1), pan_pool_weight)


# ----------------------------------------------------------------------------
# Kernel 2: x_out[i] = x[perm[i]] * score[perm[i]]
#   VMEM-resident gather: x enters as one resident VMEM block, perm in SMEM via
#   scalar prefetch, score[perm] as a (G, 1) VMEM block; one (G, C) block scaled and
#   stored per grid step.  No per-row HBM DMAs, no dummy waits.
# ----------------------------------------------------------------------------
def _gather_scale_kernel(perm_ref, s_ref, x_ref, o_ref, buf):
    G = buf.shape[0]
    base = pl.program_id(0) * G

    @pl.loop(0, G)
    def _(r):                                 # plain vector loads from resident x
        idx = perm_ref[base + r]
        buf[pl.ds(r, 1), :] = x_ref[pl.ds(idx, 1), :]

    o_ref[...] = buf[...] * s_ref[...]        # one (G, C) scale + store per step


# x resident in VMEM is only worthwhile / possible when it fits comfortably under the
# scoped-VMEM default on every generation (v7x: 32 MiB scoped / 64 MiB physical).
_VMEM_RESIDENT_X_BYTES = 16 * 1024 * 1024


def gather_scale_pallas(perm, score_perm, x):
    N, C = x.shape
    K = perm.shape[0]
    G = min(256, _round_up(K, 8))               # rows gathered per grid step
    K_pad = _round_up(K, G)
    if K_pad != K:
        pad = K_pad - K
        perm = jnp.concatenate([perm, jnp.zeros((pad,), jnp.int32)])
        score_perm = jnp.concatenate(
            [score_perm, jnp.zeros((pad,), score_perm.dtype)])
    s2d = score_perm.reshape(K_pad, 1).astype(jnp.float32)

    out = pl.pallas_call(
        _gather_scale_kernel,
        grid_spec=pltpu.PrefetchScalarGridSpec(
            num_scalar_prefetch=1,
            grid=(K_pad // G,),
            in_specs=[
                pl.BlockSpec((G, 1), lambda b, perm_ref: (b, 0)),  # score[perm] block
                pl.BlockSpec((N, C), lambda b, perm_ref: (0, 0)),  # x resident in VMEM
            ],
            out_specs=pl.BlockSpec((G, C), lambda b, perm_ref: (b, 0)),
            scratch_shapes=[pltpu.VMEM((G, C), jnp.float32)],
        ),
        out_shape=jax.ShapeDtypeStruct((K_pad, C), jnp.float32),
        compiler_params=pltpu.CompilerParams(
            dimension_semantics=("parallel",)),
    )(perm, s2d, x)
    return out[:K]


def gather_scale(perm, score_perm, x):
    if x.shape[0] * x.shape[1] * 4 <= _VMEM_RESIDENT_X_BYTES:
        return gather_scale_pallas(perm, score_perm, x)
    # TODO(synk): for x larger than VMEM a double-buffered HBM row-DMA gather kernel
    # would be needed; use the XLA gather for that regime.
    return jnp.take(x, perm, axis=0) * score_perm[:, None]


# ----------------------------------------------------------------------------
# Module wrapper (parameters initialized exactly like the PyTorch __init__)
# ----------------------------------------------------------------------------
class PANXUMPoolingPallas:
    def __init__(self, in_channels, ratio=0.5, multiplier=1):
        self.in_channels = in_channels
        self.ratio = ratio
        self.multiplier = multiplier
        self.min_score = None
        # torch.ones(in_channels) / 0.5 * torch.ones(2)  -- deterministic init
        self.transform = jnp.ones((in_channels,), jnp.float32)
        self.pan_pool_weight = 0.5 * jnp.ones((2,), jnp.float32)

    def _filter_adj(self, edge_index, edge_weight, perm, num_nodes):
        mask = jnp.full((num_nodes,), -1, jnp.int32)
        mask = mask.at[perm].set(jnp.arange(perm.shape[0], dtype=jnp.int32))
        row, col = mask[edge_index[0]], mask[edge_index[1]]
        valid = (row >= 0) & (col >= 0)
        # TODO(synk): PyTorch returns a dynamically-sized compacted edge list; on TPU we
        # return a fixed-size list with valid edges compacted to the front (stable order)
        # and invalid slots set to -1 / weight 0, plus the valid-edge count.
        order = jnp.argsort((~valid).astype(jnp.int32), stable=True)
        row_c = jnp.where(valid, row, -1)[order]
        col_c = jnp.where(valid, col, -1)[order]
        ew_c = jnp.where(valid, edge_weight, 0.0)[order]
        num_valid = jnp.sum(valid.astype(jnp.int32))
        return jnp.stack([row_c, col_c], axis=0), ew_c, num_valid

    def __call__(self, x, edge_index, M, edge_weight=None, batch=None):
        N = x.shape[0]
        if batch is None:
            batch = jnp.zeros((N,), jnp.int32)
        if edge_weight is None:
            edge_weight = jnp.ones((edge_index.shape[1],), jnp.float32)

        xf = x if x.dtype == jnp.float32 else x.astype(jnp.float32)
        Mf = M if M.dtype == jnp.float32 else M.astype(jnp.float32)

        # --- diag(M) precomputed (4 B/node instead of a (TN,TN) M block per tile)
        diag_m = jnp.diagonal(Mf).astype(jnp.float32)

        # --- Pallas kernel 1: score = tanh(w0 * x@transform + w1 * diag(M))
        score_row = score_pallas(xf.T, diag_m, self.transform,
                                 self.pan_pool_weight)        # [1, N] lane-dense
        score = score_row[0]                                  # [N]

        # --- top-k (default batch=None -> single graph -> static k = ceil(ratio*N))
        # TODO(synk): general per-graph top-k has data-dependent output sizes; only the
        # default single-graph path (and min_score=None tanh branch) is implemented.
        k = int(math.ceil(self.ratio * N))
        score_perm, perm = jax.lax.top_k(score, k)            # O(N k), not full argsort
        perm = perm.astype(jnp.int32)

        # --- Pallas kernel 2: VMEM-resident gather + scale of selected rows
        x_out = gather_scale(perm, score_perm, xf)            # [k, C]
        if self.multiplier != 1:
            x_out = self.multiplier * x_out

        batch_out = batch[perm]
        new_edge_index, new_edge_weight, num_valid = self._filter_adj(
            edge_index, edge_weight, perm, num_nodes=N)
        return (x_out, new_edge_index, new_edge_weight, batch_out, perm,
                score_perm, num_valid)


# ----------------------------------------------------------------------------
if __name__ == "__main__":
    key = jax.random.PRNGKey(0)
    N, C, E = 16, 4, 32
    k1, k2, k3 = jax.random.split(key, 3)
    x = jax.random.normal(k1, (N, C), dtype=jnp.float32)
    M = jax.random.normal(k2, (N, N), dtype=jnp.float32)
    edge_index = jax.random.randint(k3, (2, E), 0, N, dtype=jnp.int32)

    pool = PANXUMPoolingPallas(in_channels=C, ratio=0.5)
    out = jax.block_until_ready(pool(x, edge_index, M))
    x_out, new_ei, new_ew, batch_out, perm, score_perm, num_valid = out

    # Pure-JAX reference check of the kernel math.
    ref_score = jnp.tanh(0.5 * (x @ jnp.ones((C,), jnp.float32)) + 0.5 * jnp.diagonal(M))
    assert jnp.allclose(score_perm, ref_score[perm], atol=1e-5), "score mismatch"
    ref_x = x[perm] * ref_score[perm][:, None]
    assert jnp.allclose(x_out, ref_x, atol=1e-5), "pooled feature mismatch"
    assert x_out.shape == (8, C) and new_ei.shape == (2, E)

    print("KERNEL_OK")
</pallas_src>

<mosaic_0001>
module attributes {stable_mosaic.version = 11 : i64} {
  func.func @_score_kernel(%arg0: i32, %arg1: memref<4x16xf32, #tpu.memory_space<vmem>>, %arg2: memref<1x16xf32, #tpu.memory_space<vmem>>, %arg3: memref<4x1xf32, #tpu.memory_space<vmem>>, %arg4: memref<2xf32, #tpu.memory_space<smem>>, %arg5: memref<1x16xf32, #tpu.memory_space<vmem>>) attributes {dimension_semantics = [#tpu.dimension_semantics<parallel>], iteration_bounds = array<i64: 1>, scalar_prefetch = 0 : i64, scratch_operands = 0 : i64, tpu.core_type = #tpu.core_type<tc>, window_params = [{transform_indices = @transform_0, window_bounds = array<i64: 4, 16>}, {transform_indices = @transform_1, window_bounds = array<i64: 1, 16>}, {pipeline_mode = #tpu.pipeline_mode<synchronous>, transform_indices = @transform_2, window_bounds = array<i64: 4, 1>}, {transform_indices = @transform_3, window_bounds = array<i64: 2>}, {transform_indices = @transform_4, window_bounds = array<i64: 1, 16>}]} {
    %c0 = arith.constant 0 : index
    %c0_0 = arith.constant 0 : index
    %0 = vector.load %arg1[%c0, %c0_0] : memref<4x16xf32, #tpu.memory_space<vmem>>, vector<4x16xf32>
    %c0_1 = arith.constant 0 : index
    %c0_2 = arith.constant 0 : index
    %1 = vector.load %arg3[%c0_1, %c0_2] : memref<4x1xf32, #tpu.memory_space<vmem>>, vector<4x1xf32>
    %2 = vector.broadcast %1 : vector<4x1xf32> to vector<4x16xf32>
    %3 = arith.mulf %0, %2 : vector<4x16xf32>
    %cst = arith.constant dense<0.000000e+00> : vector<16xf32>
    %4 = vector.multi_reduction <add>, %3, %cst [0] : vector<4x16xf32> to vector<16xf32>
    %5 = vector.shape_cast %4 : vector<16xf32> to vector<1x16xf32>
    %c0_3 = arith.constant 0 : index
    %6 = memref.load %arg4[%c0_3] : memref<2xf32, #tpu.memory_space<smem>>
    %c1 = arith.constant 1 : index
    %7 = memref.load %arg4[%c1] : memref<2xf32, #tpu.memory_space<smem>>
    %8 = vector.broadcast %6 : f32 to vector<1x16xf32>
    %9 = arith.mulf %8, %5 : vector<1x16xf32>
    %c0_4 = arith.constant 0 : index
    %c0_5 = arith.constant 0 : index
    %10 = vector.load %arg2[%c0_4, %c0_5] : memref<1x16xf32, #tpu.memory_space<vmem>>, vector<1x16xf32>
    %11 = vector.broadcast %7 : f32 to vector<1x16xf32>
    %12 = arith.mulf %11, %10 : vector<1x16xf32>
    %13 = arith.addf %9, %12 : vector<1x16xf32>
    %14 = math.tanh %13 : vector<1x16xf32>
    %c0_6 = arith.constant 0 : index
    %c0_7 = arith.constant 0 : index
    %15 = vector.load %arg5[%c0_6, %c0_7] : memref<1x16xf32, #tpu.memory_space<vmem>>, vector<1x16xf32>
    tpu.vector_store %arg5[%c0_6, %c0_7], %14 {strides = array<i32>} : memref<1x16xf32, #tpu.memory_space<vmem>>, vector<1x16xf32>,
    return
  }
  func.func @transform_0(%arg0: i32) -> (i32, i32) {
    %c0_i32 = arith.constant 0 : i32
    %c0_i32_0 = arith.constant 0 : i32
    return %c0_i32, %arg0 : i32, i32
  }
  func.func @transform_1(%arg0: i32) -> (i32, i32) {
    %c0_i32 = arith.constant 0 : i32
    %c0_i32_0 = arith.constant 0 : i32
    return %c0_i32, %arg0 : i32, i32
  }
  func.func @transform_2(%arg0: i32) -> (i32, i32) {
    %c0_i32 = arith.constant 0 : i32
    %c0_i32_0 = arith.constant 0 : i32
    %c0_i32_1 = arith.constant 0 : i32
    return %c0_i32, %c0_i32_0 : i32, i32
  }
  func.func @transform_3(%arg0: i32) -> i32 {
    %c0_i32 = arith.constant 0 : i32
    %c0_i32_0 = arith.constant 0 : i32
    return %c0_i32 : i32
  }
  func.func @transform_4(%arg0: i32) -> (i32, i32) {
    %c0_i32 = arith.constant 0 : i32
    %c0_i32_0 = arith.constant 0 : i32
    return %c0_i32, %arg0 : i32, i32
  }
}

</mosaic_0001>

<bundles_post_ra>
// kernel: tpu_custom_call.1
= control target key start
LH: loop header
LB: loop body
LE: loop exit
PB: predicated region body
PF: predicated region fallthrough
CT: control target
= control target key end

     0   :  { %9 = vsyncpa [#allocation4], 0  ;;  %s170_s0 = inlined_call_operand.vmem [shape: f32[4,16], index: 0, kind: input, shape index: {}]   ;;  %s171_s1 = inlined_call_operand.vmem [shape: f32[1,16], index: 1, kind: input, shape index: {}]   ;;  %s172_s2 = inlined_call_operand.vmem [shape: f32[4,1], index: 2, kind: input, shape index: {}]   ;;  %s173_s3 = inlined_call_operand.vmem [shape: f32[2], index: 3, kind: input, shape index: {}]   ;;  %s174_s4 = inlined_call_operand.hbm [shape: f32[1,16], index: 4, kind: output, shape index: {}]  }
   0x1   :  { %10 = vsyncpa [#allocation3], 0  ;;  %s23_s17 = sshll.u32 %s173_s3, 4  ;;  %s24_s17 = int_to_ptr.vmem [resolvable:$true] %s23_s17 }
   0x2   :  { %s80_s18 = scalar_lea.vmem %s24_s17, 16  ;;  %p85_p1 = scmp.lt.s32.totalorder %s24_s17, %s24_s17 }
   0x3   :  { %p81_p0 = scmp.ne.s32.totalorder %s24_s17, %s80_s18  ;;  %p86_p2 = scmp.lt.s32.totalorder %s80_s18, %s80_s18 }
   0x5   :  { %p87_p3 = por %p86_p2, %p85_p1 }
   0x7   :  { %p88_p4 = pnand %p87_p3, %p81_p0 }
   0x9   :  { %91 = shalt.err (!%p88_p4)
}
   0xa   :  { %s118_s19 = smov [#allocation2]  }
   0xb   :  { %26 = dma.vmem_to_smem %s24_s17, 16, %s118_s19, [#allocation4]  }
   0xc   :  { %114 = dma.done.wait [#allocation4], 16  }
   0xd   :  { %115 = vsyncadd [#allocation4], 4294967280 }
   0xe   :  { %30 = sfence }
   0xf   :  { %v32_v0 = vld [vmem:[%s172_s2] sm:$0xf]  ;;  %v119_v1 = vmov 0   ;;  %vm39_vm0 = vcmask 125952   ;;  %s73_s23 = sld [smem:[#allocation2 + $0x1]]  ;;  %s47_s24 = sld [smem:[#allocation2]] }
  0x10   :  { %77 = vset.pattern.permute.xlu0 %v119_v1  ;;  %v31_v2 = vld [vmem:[%s170_s0] sm:$0xf]  ;;  %s120_s0 = smov [#allocation5]   ;;  %vm56_vm1 = vcmask 122880  }
  0x11   :  { %35 = vperm.xlu0 %77, %v32_v0   ;;  %v51_v10 = vld [vmem:[%s171_s1] sm:$0x1]  ;;  %s64_s2 = sshll.u32 %s120_s0, 4  ;;  %s65_s2 = int_to_ptr.vmem [resolvable:$true] %s64_s2 }
  0x12   :  { %s92_s27 = scalar_lea.vmem %s65_s2, 16  ;;  %s96_s28 = scalar_lea.vmem %s65_s2, 32 }
  0x13   :  { %p93_p5 = scmp.ne.s32.totalorder %s65_s2, %s92_s27  ;;  %p97_p6 = scmp.lt.s32.totalorder %s65_s2, %s65_s2 }
  0x14   :  { %p98_p7 = scmp.lt.s32.totalorder %s96_s28, %s92_s27 }
  0x15   :  { %v52_v11 = vstv %s73_s23  ;;  %v49_v13 = vstv %s47_s24 }
  0x16   :  { %v53_v14 = vmul.f32 %v52_v11, %v51_v10  ;;  %p99_p8 = por %p98_p7, %p97_p6 }
  0x18   :  { %p100_p9 = pnand %p99_p8, %p93_p5 }
  0x90   :  { %v36_v3 = vpop.permute.xlu0 %35 }
  0x91   :  { %v38_v4 = vmul.f32 %v36_v3, %v31_v2 }
  0x93   :  { %v40_v5 = vsel %vm39_vm0, %v38_v4, 0.0 }
  0x94   :  { %v41_v6 = vrot.slane %v40_v5, 4 }
  0x96   :  { %v42_v7 = vadd.f32 %v41_v6, %v40_v5 }
  0x98   :  { %v43_v8 = vrot.slane %v42_v7, 2 }
  0x9a   :  { %v44_v9 = vadd.f32 %v43_v8, %v42_v7 }
  0x9c   :  { %v45_v12 = vrot.slane %v44_v9, 1 }
  0x9e   :  { %v46_v15 = vadd.f32 %v45_v12, %v44_v9 }
  0xa0   :  { %v50_v16 = vmul.f32 %v49_v13, %v46_v15 }
  0xa2   :  { %v54_v17 = vadd.f32 %v53_v14, %v50_v16 }
  0xa4   :  { %78 = vtanh.f32 %v54_v17 }
  0xae   :  { %v79_v18 = vpop.eup %78 }
  0xaf   :  { %57 = vst.msk [vmem:[#allocation5] sm:$0x1] %vm56_vm1, %v79_v18 }
  0xb0   :  { %103 = shalt.err (!%p100_p9)
}
  0xb1   :  { %s104_s30 = scalar_lea.hbm %s174_s4, 16 }
  0xb2   :  { %p105_p10 = scmp.ne.s32.totalorder %s174_s4, %s104_s30  ;;  %p108_p11 = scmp.lt.u32.totalorder %s104_s30, %s174_s4 }
  0xb4   :  { %p110_p12 = pnand %p108_p11, %p105_p10 }
  0xb6   :  { %113 = shalt.err (!%p110_p12)
}
  0xb7   :  { %67 = dma.vmem_to_hbm [thread:$0]  %s65_s2, 16, %s174_s4, [#allocation3]  }
  0xb8   :  { %116 = dma.done.wait [#allocation3], 16  }
  0xb9   :  { %117 = vsyncadd [#allocation3], 4294967280 }
  0xba   :  { %71 = vsyncpa [#allocation3], 1 }
  0xbb   :  { %72 = vsyncpa [#allocation4], 1 }

</bundles_post_ra>
